<compile_context>
chip_gen: v6e
topology: v6e:2x2x1
jax: 0.10.0
libtpu: 0.0.40
codegen_flags: <defaults>
</compile_context>

<pallas_src>
import jax
import jax.numpy as jnp
from jax.experimental import pallas as pl
from jax.experimental.pallas import tpu as pltpu


# ----------------------------- kernels ------------------------------------- #

def _bigram_loss_kernel(idx_ref, tgt_ref, emb_ref, logits_ref, nll_ref):
    # idx_ref   : (TILE_N, 1) int32   token ids for this tile
    # tgt_ref   : (TILE_N, 1) int32   target ids for this tile
    # emb_ref   : (V, V)      float32 embedding table (resident across grid)
    # logits_ref: (TILE_N, V) float32 output logits tile
    # nll_ref   : (TILE_N, 1) float32 per-row negative log-likelihood
    tile_n, V = logits_ref.shape

    idx = idx_ref[...]                                              # (TILE_N, 1)
    tgt = tgt_ref[...]                                              # (TILE_N, 1)
    vocab_iota = jax.lax.broadcasted_iota(jnp.int32, (tile_n, V), 1)

    # Embedding lookup as one-hot matmul on the MXU (exact row selection in f32).
    onehot = (idx == vocab_iota).astype(jnp.float32)                # (TILE_N, V)
    logits = jnp.dot(onehot, emb_ref[...],
                     preferred_element_type=jnp.float32)            # (TILE_N, V)
    logits_ref[...] = logits

    # Per-row cross-entropy term: logsumexp(logits) - logits[target].
    m = jnp.max(logits, axis=-1, keepdims=True)                     # (TILE_N, 1)
    lse = m + jnp.log(jnp.sum(jnp.exp(logits - m), axis=-1, keepdims=True))
    tgt_onehot = (tgt == vocab_iota).astype(jnp.float32)
    tgt_logit = jnp.sum(logits * tgt_onehot, axis=-1, keepdims=True)
    nll_ref[...] = lse - tgt_logit


def _bigram_logits_kernel(idx_ref, emb_ref, logits_ref):
    # Inference path: logits only, no cross-entropy work, no target DMA.
    tile_n, V = logits_ref.shape
    idx = idx_ref[...]                                              # (TILE_N, 1)
    vocab_iota = jax.lax.broadcasted_iota(jnp.int32, (tile_n, V), 1)
    onehot = (idx == vocab_iota).astype(jnp.float32)
    logits_ref[...] = jnp.dot(onehot, emb_ref[...],
                              preferred_element_type=jnp.float32)


# ----------------------------- wrapper -------------------------------------- #

def _round_up(x, m):
    return ((x + m - 1) // m) * m


def _choose_tile_n(N, V):
    # Keep each double-buffered logits tile within ~4 MiB of VMEM; cap at 512
    # rows (plenty to fill the 256-wide MXU on v6e/v7x, 128-wide on v5e).
    rows_by_vmem = max(8, (4 * 1024 * 1024) // (2 * V * 4))
    tile = min(512, rows_by_vmem)
    tile = max(8, (tile // 8) * 8)
    if N <= tile:
        return max(8, _round_up(N, 8))
    return tile


def _vmem_limit_bytes(tile_n, V, with_targets):
    emb_bytes = V * V * 4                         # resident table
    stream = tile_n * V * 4 + tile_n * 4          # logits tile + idx tile
    if with_targets:
        stream += 2 * tile_n * 4                  # tgt tile + nll tile
    needed = 2 * emb_bytes + 2 * stream           # 2x for pipeline buffers
    return int(min(max(needed + (8 << 20), 16 << 20), 64 << 20))


def bigram_forward(idx, embedding_table, targets=None):
    """JAX/Pallas equivalent of BigramLanguageModel.forward.

    idx:     (B, T) int32 token ids
    targets: (B, T) int32 or None
    Returns (logits, loss):
      - targets is None -> logits shape (B, T, V), loss None
      - else            -> logits shape (B*T, V), loss scalar (mean CE)
    """
    B, T = idx.shape
    V = embedding_table.shape[0]
    assert embedding_table.shape == (V, V)
    # TODO(synk): support vocab sizes not divisible by 128 by padding the table
    # columns and masking them to -inf before the softmax.
    assert V % 128 == 0, "kernel path requires vocab_size to be a multiple of 128"

    N = B * T
    tile_n = _choose_tile_n(N, V)
    n_pad = _round_up(N, tile_n)
    num_tiles = n_pad // tile_n
    with_targets = targets is not None

    idx_flat = jnp.pad(idx.reshape(-1).astype(jnp.int32),
                       (0, n_pad - N)).reshape(n_pad, 1)
    emb = embedding_table.astype(jnp.float32)

    compiler_params = pltpu.CompilerParams(
        dimension_semantics=("parallel",),
        vmem_limit_bytes=_vmem_limit_bytes(tile_n, V, with_targets),
    )

    if with_targets:
        tgt_flat = jnp.pad(targets.reshape(-1).astype(jnp.int32),
                           (0, n_pad - N)).reshape(n_pad, 1)
        cost = pl.CostEstimate(
            flops=2 * n_pad * V * V,
            transcendentals=n_pad * V,
            bytes_accessed=V * V * 4 + n_pad * V * 4 + 3 * n_pad * 4,
        )
        logits_flat, nll = pl.pallas_call(
            _bigram_loss_kernel,
            grid=(num_tiles,),
            out_shape=(
                jax.ShapeDtypeStruct((n_pad, V), jnp.float32),
                jax.ShapeDtypeStruct((n_pad, 1), jnp.float32),
            ),
            in_specs=[
                pl.BlockSpec((tile_n, 1), lambda i: (i, 0)),   # idx tile
                pl.BlockSpec((tile_n, 1), lambda i: (i, 0)),   # tgt tile
                pl.BlockSpec((V, V), lambda i: (0, 0)),        # table, resident
            ],
            out_specs=(
                pl.BlockSpec((tile_n, V), lambda i: (i, 0)),   # logits tile
                pl.BlockSpec((tile_n, 1), lambda i: (i, 0)),   # per-row NLL
            ),
            compiler_params=compiler_params,
            cost_estimate=cost,
        )(idx_flat, tgt_flat, emb)

        # Finish the mean in the wrapper: keeps the grid axis "parallel" and
        # masks out any padded rows / uses the true token count N.
        loss = jnp.sum(nll[:N, 0]) / jnp.float32(N)
        return logits_flat[:N], loss

    # Inference path: logits only.
    cost = pl.CostEstimate(
        flops=2 * n_pad * V * V,
        transcendentals=0,
        bytes_accessed=V * V * 4 + n_pad * V * 4 + n_pad * 4,
    )
    logits_flat = pl.pallas_call(
        _bigram_logits_kernel,
        grid=(num_tiles,),
        out_shape=jax.ShapeDtypeStruct((n_pad, V), jnp.float32),
        in_specs=[
            pl.BlockSpec((tile_n, 1), lambda i: (i, 0)),       # idx tile
            pl.BlockSpec((V, V), lambda i: (0, 0)),            # table, resident
        ],
        out_specs=pl.BlockSpec((tile_n, V), lambda i: (i, 0)),
        compiler_params=compiler_params,
        cost_estimate=cost,
    )(idx_flat, emb)

    return logits_flat[:N].reshape(B, T, V), None


# ------------------------------- demo --------------------------------------- #

if __name__ == "__main__":
    vocab_size = 128   # multiple of 128 -> vocab dim maps cleanly to lanes
    B, T = 2, 8

    key = jax.random.PRNGKey(0)
    k_emb, k_idx, k_tgt = jax.random.split(key, 3)

    # nn.Embedding default init ~ N(0, 1)
    embedding_table = jax.random.normal(k_emb, (vocab_size, vocab_size),
                                        dtype=jnp.float32)
    idx = jax.random.randint(k_idx, (B, T), 0, vocab_size, dtype=jnp.int32)
    targets = jax.random.randint(k_tgt, (B, T), 0, vocab_size, dtype=jnp.int32)

    # With targets: returns (B*T, V) logits and scalar mean cross-entropy loss.
    logits, loss = bigram_forward(idx, embedding_table, targets)
    jax.block_until_ready((logits, loss))

    # Without targets: returns (B, T, V) logits and None.
    logits_nt, loss_nt = bigram_forward(idx, embedding_table, None)
    jax.block_until_ready(logits_nt)

    # Reference check against plain JAX.
    ref_logits = embedding_table[idx.reshape(-1)]                 # (B*T, V)
    ref_lse = jax.nn.logsumexp(ref_logits, axis=-1)
    ref_tgt = ref_logits[jnp.arange(B * T), targets.reshape(-1)]
    ref_loss = jnp.mean(ref_lse - ref_tgt)

    assert logits.shape == (B * T, vocab_size)
    assert jnp.allclose(logits, ref_logits, atol=1e-5)
    assert jnp.allclose(loss, ref_loss, atol=1e-5)
    assert loss_nt is None and logits_nt.shape == (B, T, vocab_size)
    assert jnp.allclose(logits_nt.reshape(B * T, vocab_size), ref_logits,
                        atol=1e-5)

    print("KERNEL_OK")
</pallas_src>

<mosaic_0001>
module attributes {stable_mosaic.version = 11 : i64} {
  func.func @_bigram_loss_kernel(%arg0: i32, %arg1: memref<16x1xi32, #tpu.memory_space<vmem>>, %arg2: memref<16x1xi32, #tpu.memory_space<vmem>>, %arg3: memref<128x128xf32, #tpu.memory_space<vmem>>, %arg4: memref<16x128xf32, #tpu.memory_space<vmem>>, %arg5: memref<16x1xf32, #tpu.memory_space<vmem>>) attributes {dimension_semantics = [#tpu.dimension_semantics<parallel>], iteration_bounds = array<i64: 1>, scalar_prefetch = 0 : i64, scratch_operands = 0 : i64, tpu.core_type = #tpu.core_type<tc>, window_params = [{transform_indices = @transform_0, window_bounds = array<i64: 16, 1>}, {transform_indices = @transform_1, window_bounds = array<i64: 16, 1>}, {pipeline_mode = #tpu.pipeline_mode<synchronous>, transform_indices = @transform_2, window_bounds = array<i64: 128, 128>}, {transform_indices = @transform_3, window_bounds = array<i64: 16, 128>}, {transform_indices = @transform_4, window_bounds = array<i64: 16, 1>}]} {
    %c0 = arith.constant 0 : index
    %c0_0 = arith.constant 0 : index
    %0 = vector.load %arg1[%c0, %c0_0] : memref<16x1xi32, #tpu.memory_space<vmem>>, vector<16x1xi32>
    %c0_1 = arith.constant 0 : index
    %c0_2 = arith.constant 0 : index
    %1 = vector.load %arg2[%c0_1, %c0_2] : memref<16x1xi32, #tpu.memory_space<vmem>>, vector<16x1xi32>
    %2 = tpu.iota {dimensions = array<i32: 1>} : vector<16x128xi32>
    %3 = vector.broadcast %0 : vector<16x1xi32> to vector<16x128xi32>
    %4 = arith.cmpi eq, %3, %2 : vector<16x128xi32>
    %5 = arith.extui %4 : vector<16x128xi1> to vector<16x128xi32>
    %6 = arith.sitofp %5 : vector<16x128xi32> to vector<16x128xf32>
    %c0_3 = arith.constant 0 : index
    %c0_4 = arith.constant 0 : index
    %7 = vector.load %arg3[%c0_3, %c0_4] : memref<128x128xf32, #tpu.memory_space<vmem>>, vector<128x128xf32>
    %cst = arith.constant dense<0.000000e+00> : vector<16x128xf32>
    %8 = tpu.matmul %6, %7, %cst {dimension_numbers = #tpu.dot_dimension_numbers<[1], [0], [0], [1], [0, 0, 1, 1], [], []>} : vector<16x128xf32>, vector<128x128xf32>, vector<16x128xf32> -> vector<16x128xf32>
    %c0_5 = arith.constant 0 : index
    %c0_6 = arith.constant 0 : index
    %9 = vector.load %arg4[%c0_5, %c0_6] : memref<16x128xf32, #tpu.memory_space<vmem>>, vector<16x128xf32>
    tpu.vector_store %arg4[%c0_5, %c0_6], %8 {strides = array<i32>} : memref<16x128xf32, #tpu.memory_space<vmem>>, vector<16x128xf32>,
    %cst_7 = arith.constant dense<0xFF800000> : vector<16xf32>
    %10 = vector.multi_reduction <maximumf>, %8, %cst_7 [1] : vector<16x128xf32> to vector<16xf32>
    %11 = vector.shape_cast %10 : vector<16xf32> to vector<16x1xf32>
    %12 = vector.broadcast %11 : vector<16x1xf32> to vector<16x128xf32>
    %13 = arith.subf %8, %12 : vector<16x128xf32>
    %14 = math.exp %13 : vector<16x128xf32>
    %cst_8 = arith.constant dense<0.000000e+00> : vector<16xf32>
    %15 = vector.multi_reduction <add>, %14, %cst_8 [1] : vector<16x128xf32> to vector<16xf32>
    %16 = vector.shape_cast %15 : vector<16xf32> to vector<16x1xf32>
    %17 = math.log %16 : vector<16x1xf32>
    %18 = arith.addf %11, %17 : vector<16x1xf32>
    %19 = vector.broadcast %1 : vector<16x1xi32> to vector<16x128xi32>
    %20 = arith.cmpi eq, %19, %2 : vector<16x128xi32>
    %21 = arith.extui %20 : vector<16x128xi1> to vector<16x128xi32>
    %22 = arith.sitofp %21 : vector<16x128xi32> to vector<16x128xf32>
    %23 = arith.mulf %8, %22 : vector<16x128xf32>
    %cst_9 = arith.constant dense<0.000000e+00> : vector<16xf32>
    %24 = vector.multi_reduction <add>, %23, %cst_9 [1] : vector<16x128xf32> to vector<16xf32>
    %25 = vector.shape_cast %24 : vector<16xf32> to vector<16x1xf32>
    %26 = arith.subf %18, %25 : vector<16x1xf32>
    %c0_10 = arith.constant 0 : index
    %c0_11 = arith.constant 0 : index
    %27 = vector.load %arg5[%c0_10, %c0_11] : memref<16x1xf32, #tpu.memory_space<vmem>>, vector<16x1xf32>
    tpu.vector_store %arg5[%c0_10, %c0_11], %26 {strides = array<i32>} : memref<16x1xf32, #tpu.memory_space<vmem>>, vector<16x1xf32>,
    return
  }
  func.func @transform_0(%arg0: i32) -> (i32, i32) {
    %c0_i32 = arith.constant 0 : i32
    %c0_i32_0 = arith.constant 0 : i32
    return %arg0, %c0_i32 : i32, i32
  }
  func.func @transform_1(%arg0: i32) -> (i32, i32) {
    %c0_i32 = arith.constant 0 : i32
    %c0_i32_0 = arith.constant 0 : i32
    return %arg0, %c0_i32 : i32, i32
  }
  func.func @transform_2(%arg0: i32) -> (i32, i32) {
    %c0_i32 = arith.constant 0 : i32
    %c0_i32_0 = arith.constant 0 : i32
    %c0_i32_1 = arith.constant 0 : i32
    return %c0_i32, %c0_i32_0 : i32, i32
  }
  func.func @transform_3(%arg0: i32) -> (i32, i32) {
    %c0_i32 = arith.constant 0 : i32
    %c0_i32_0 = arith.constant 0 : i32
    return %arg0, %c0_i32 : i32, i32
  }
  func.func @transform_4(%arg0: i32) -> (i32, i32) {
    %c0_i32 = arith.constant 0 : i32
    %c0_i32_0 = arith.constant 0 : i32
    return %arg0, %c0_i32 : i32, i32
  }
}

</mosaic_0001>

<bundles_post_ra>
// kernel: tpu_custom_call.1
= control target key start
LH: loop header
LB: loop body
LE: loop exit
PB: predicated region body
PF: predicated region fallthrough
CT: control target
= control target key end

     0   :  { %10 = vsyncpa [#allocation3], 0  ;;  %s388_s0 = inlined_call_operand.vmem [shape: s32[16,1], index: 0, kind: input, shape index: {}]   ;;  %s389_s1 = inlined_call_operand.vmem [shape: s32[16,1], index: 1, kind: input, shape index: {}]   ;;  %s390_s2 = inlined_call_operand.hbm [shape: f32[128,128], index: 2, kind: input, shape index: {}]   ;;  %s391_s3 = inlined_call_operand.hbm [shape: f32[16,128], index: 3, kind: output, shape index: {0}]   ;;  %s392_s4 = inlined_call_operand.vmem [shape: f32[16,1], index: 4, kind: output, shape index: {1}]  }
   0x1   :  { %11 = vsyncpa [#allocation4], 0  ;;  %s326_s15 = smov [#allocation2]  }
   0x2   :  { %s21_s16 = sshll.u32 %s326_s15, 4  ;;  %s22_s16 = int_to_ptr.vmem [resolvable:$true] %s21_s16 }
   0x3   :  { %s290_s17 = scalar_lea.vmem %s22_s16, 2048  ;;  %p295_p1 = scmp.lt.s32.totalorder %s22_s16, %s22_s16 }
   0x4   :  { %p291_p0 = scmp.ne.s32.totalorder %s22_s16, %s290_s17  ;;  %p296_p2 = scmp.lt.s32.totalorder %s290_s17, %s290_s17 }
   0x6   :  { %p297_p3 = por %p296_p2, %p295_p1 }
   0x8   :  { %p298_p4 = pnand %p297_p3, %p291_p0 }
   0xa   :  { %301 = shalt.err (!%p298_p4)
}
   0xb   :  { %s327_s18 = smov 128   ;;  %s328_s19 = smov 8  }
   0xc   :  { %27 = dma.hbm_to_vmem [thread:$0]  %s390_s2, 2048, %s22_s16, [#allocation3], %s327_s18, %s327_s18, %s328_s19  }
   0xd   :  { %322 = dma.done.wait [#allocation3], 2048  }
   0xe   :  { %323 = vsyncadd [#allocation3], 4294965248  ;;  %v329_v0 = vmov 0   ;;  %v31_v1 = vld [vmem:[%s388_s0] sm:$0xff]  ;;  %v64_v2 = vld [vmem:[#allocation2 + $0x78] sm:$0xff]  ;;  %v35_v20 = vlaneseq  ;;  %v330_v23 = vmov 1.0  }
   0xf   :  { %272 = vset.pattern.permute.xlu0 %v329_v0  ;;  %273 = vset.pattern.permute.xlu1 %v329_v0  ;;  %v63_v3 = vld [vmem:[#allocation2 + $0x70] sm:$0xff]  ;;  %v32_v4 = vld [vmem:[%s388_s0 + $0x8] sm:$0xff]  ;;  %v61_v6 = vld [vmem:[#allocation2 + $0x60] sm:$0xff]  ;;  %v331_v37 = vmov 0.0  }
  0x10   :  { %38 = vperm.xlu0 %272, %v31_v1   ;;  %230 = vmatprep.subr.mxu0 %v64_v2  ;;  %v62_v5 = vld [vmem:[#allocation2 + $0x68] sm:$0xff]  ;;  %v33_v7 = vld [vmem:[%s389_s1] sm:$0xff]  ;;  %v60_v8 = vld [vmem:[#allocation2 + $0x58] sm:$0xff]  ;;  %v36_v21 = vand.u32 127, %v35_v20 }
  0x11   :  { %231 = vmatpush3.msra.mxu0 %v64_v2  ;;  %v59_v9 = vld [vmem:[#allocation2 + $0x50] sm:$0xff]  ;;  %v58_v10 = vld [vmem:[#allocation2 + $0x48] sm:$0xff]  ;;  %v57_v11 = vld [vmem:[#allocation2 + $0x40] sm:$0xff] }
  0x12   :  { %232 = vmatprep.subr.mxu0 %v63_v3  ;;  %v56_v12 = vld [vmem:[#allocation2 + $0x38] sm:$0xff]  ;;  %v55_v13 = vld [vmem:[#allocation2 + $0x30] sm:$0xff]  ;;  %v54_v14 = vld [vmem:[#allocation2 + $0x28] sm:$0xff] }
  0x13   :  { %233 = vmatpush3.msra.mxu0 %v63_v3  ;;  %v53_v15 = vld [vmem:[#allocation2 + $0x20] sm:$0xff]  ;;  %v52_v16 = vld [vmem:[#allocation2 + $0x18] sm:$0xff]  ;;  %v51_v17 = vld [vmem:[#allocation2 + $0x10] sm:$0xff] }
  0x14   :  { %41 = vperm.xlu0 %272, %v32_v4   ;;  %234 = vmatprep.subr.mxu0 %v62_v5  ;;  %v50_v18 = vld [vmem:[#allocation2 + $0x8] sm:$0xff]  ;;  %v49_v19 = vld [vmem:[#allocation2] sm:$0xff] }
  0x15   :  { %235 = vmatpush3.msra.mxu0 %v62_v5  ;;  %v34_v27 = vld [vmem:[%s389_s1 + $0x8] sm:$0xff]  ;;  %s332_s1 = smov [#allocation5]  }
  0x16   :  { %236 = vmatprep.subr.mxu0 %v61_v6  ;;  %s190_s28 = sshll.u32 %s332_s1, 4  ;;  %s191_s28 = int_to_ptr.vmem [resolvable:$true] %s190_s28 }
  0x17   :  { %237 = vmatpush3.msra.mxu0 %v61_v6  ;;  %s302_s29 = scalar_lea.vmem %s191_s28, 256  ;;  %p307_p6 = scmp.lt.s32.totalorder %s191_s28, %s191_s28 }
  0x18   :  { %163 = vperm.xlu0 %272, %v33_v7   ;;  %238 = vmatprep.subr.mxu0 %v60_v8  ;;  %p303_p5 = scmp.ne.s32.totalorder %s191_s28, %s302_s29  ;;  %p308_p7 = scmp.lt.s32.totalorder %s302_s29, %s302_s29 }
  0x19   :  { %239 = vmatpush3.msra.mxu0 %v60_v8 }
  0x1a   :  { %240 = vmatprep.subr.mxu0 %v59_v9  ;;  %p309_p8 = por %p308_p7, %p307_p6 }
  0x1b   :  { %241 = vmatpush3.msra.mxu0 %v59_v9 }
  0x1c   :  { %242 = vmatprep.subr.mxu0 %v58_v10  ;;  %p310_p9 = pnand %p309_p8, %p303_p5 }
  0x1d   :  { %243 = vmatpush3.msra.mxu0 %v58_v10 }
  0x1e   :  { %244 = vmatprep.subr.mxu0 %v57_v11 }
  0x1f   :  { %245 = vmatpush3.msra.mxu0 %v57_v11 }
  0x20   :  { %246 = vmatprep.subr.mxu0 %v56_v12 }
  0x21   :  { %247 = vmatpush3.msra.mxu0 %v56_v12 }
  0x22   :  { %248 = vmatprep.subr.mxu0 %v55_v13 }
  0x23   :  { %249 = vmatpush3.msra.mxu0 %v55_v13 }
  0x24   :  { %250 = vmatprep.subr.mxu0 %v54_v14 }
  0x25   :  { %251 = vmatpush3.msra.mxu0 %v54_v14 }
  0x26   :  { %252 = vmatprep.subr.mxu0 %v53_v15 }
  0x27   :  { %253 = vmatpush3.msra.mxu0 %v53_v15 }
  0x28   :  { %254 = vmatprep.subr.mxu0 %v52_v16 }
  0x29   :  { %255 = vmatpush3.msra.mxu0 %v52_v16 }
  0x2a   :  { %256 = vmatprep.subr.mxu0 %v51_v17 }
  0x2b   :  { %257 = vmatpush3.msra.mxu0 %v51_v17 }
  0x2c   :  { %258 = vmatprep.subr.mxu0 %v50_v18 }
  0x2d   :  { %259 = vmatpush3.msra.mxu0 %v50_v18 }
  0x2e   :  { %260 = vmatprep.subr.mxu0 %v49_v19 }
  0x2f   :  { %261 = vmatpush3.msra.mxu0 %v49_v19 }
  0x8b   :  { %v39_v22 = vpop.permute.xlu0 %38 }
  0x8c   :  { %vm43_vm0 = vcmp.eq.s32.totalorder %v39_v22, %v36_v21 }
  0x8d   :  { %262 = vmatprep.mubr.msk.f32.mxu0 %vm43_vm0, %v330_v23 }
  0x8f   :  { %v42_v24 = vpop.permute.xlu0 %41 }
  0x90   :  { %vm44_vm1 = vcmp.eq.s32.totalorder %v42_v24, %v36_v21 }
  0x91   :  { %263 = vmatmul.mubr.msk.f32.vlgmr.msra.gmra.mxu0 %vm44_vm1, %v330_v23 }
  0x93   :  { %v164_v34 = vpop.permute.xlu0 %163 }
  0x94   :  { %vm168_vm2 = vcmp.eq.s32.totalorder %v164_v34, %v36_v21 }
  0x95   :  { %v210_v38 = vsel %vm168_vm2, 1.0, %v331_v37 }
 0x151   :  { %v264_v25 = vpop.f32.mrf.mxu0 }
 0x152   :  { %141 = vst [vmem:[#allocation5 + $0x8] sm:$0xff] %v264_v25 }
 0x153   :  { %v131_v26 = vpop.f32.mrf.mxu0 }
 0x154   :  { %140 = vst [vmem:[#allocation5] sm:$0xff] %v131_v26  ;;  %142 = vmax.xlane.f32.xlu1 %v131_v26  ;;  %v174_v39 = vmul.f32 %v210_v38, %v131_v26 }
 0x158   :  { %144 = vmax.xlane.f32.xlu1 %v264_v25 }
 0x169   :  { %166 = vperm.xlu1 %273, %v34_v27  }
 0x1dd   :  { %v143_v28 = vpop.xlane.xlu1 %142 }
 0x1de   :  { %v146_v29 = vsub.f32 %v131_v26, %v143_v28 }
 0x1e0   :  { %v148_v30 = vmul.f32 1.442695, %v146_v29 }
 0x1e1   :  { %v145_v31 = vpop.xlane.xlu1 %144 }
 0x1e2   :  { %274 = vpow2.f32 %v148_v30  ;;  %v147_v32 = vsub.f32 %v264_v25, %v145_v31 }
 0x1e4   :  { %v150_v33 = vmul.f32 1.442695, %v147_v32 }
 0x1e5   :  { %v167_v35 = vpop.permute.xlu1 %166 }
 0x1e6   :  { %276 = vpow2.f32 %v150_v33  ;;  %vm169_vm3 = vcmp.eq.s32.totalorder %v167_v35, %v36_v21 }
 0x1e7   :  { %v211_v41 = vsel %vm169_vm3, 1.0, %v331_v37 }
 0x1e8   :  { %v175_v42 = vmul.f32 %v264_v25, %v211_v41 }
 0x1ef   :  { %v275_v36 = vpop.eup %274 }
 0x1f0   :  { %152 = vadd.xlane.f32.xlu0 %v275_v36 }
 0x1f3   :  { %v277_v40 = vpop.eup %276 }
 0x1f4   :  { %154 = vadd.xlane.f32.xlu1 %v277_v40  ;;  %176 = vadd.xlane.f32.xlu0 %v174_v39 }
 0x1f8   :  { %178 = vadd.xlane.f32.xlu0 %v175_v42 }
 0x1f9   :  { %313 = shalt.err (!%p310_p9)
}
 0x1fa   :  { %196 = dma.vmem_to_hbm [thread:$0]  %s191_s28, 256, %s391_s3, [#allocation4], %s327_s18, %s327_s18, %s328_s19   ;;  %vm182_vm4 = vcmask 7168  }
 0x279   :  { %v153_v43 = vpop.xlane.xlu0 %152 }
 0x27a   :  { %278 = vlog2.f32 %v153_v43 }
 0x27d   :  { %v155_v44 = vpop.xlane.xlu1 %154  ;;  %v177_v47 = vpop.xlane.xlu0 %176 }
 0x27e   :  { %280 = vlog2.f32 %v155_v44 }
 0x281   :  { %v179_v53 = vpop.xlane.xlu0 %178 }
 0x287   :  { %v279_v45 = vpop.eup %278 }
 0x288   :  { %v157_v46 = vmul.f32 0.6931472, %v279_v45 }
 0x28a   :  { %v160_v48 = vadd.f32 %v157_v46, %v143_v28 }
 0x28b   :  { %v281_v49 = vpop.eup %280 }
 0x28c   :  { %v159_v50 = vmul.f32 0.6931472, %v281_v49  ;;  %v180_v51 = vsub.f32 %v160_v48, %v177_v47 }
 0x28e   :  { %183 = vst.msk [vmem:[%s392_s4] sm:$0xff] %vm182_vm4, %v180_v51  ;;  %v161_v52 = vadd.f32 %v159_v50, %v145_v31 }
 0x290   :  { %v181_v54 = vsub.f32 %v161_v52, %v179_v53 }
 0x292   :  { %184 = vst.msk [vmem:[%s392_s4 + $0x8] sm:$0xff] %vm182_vm4, %v181_v54 }
 0x293   :  { %324 = dma.done.wait [#allocation4], 256  }
 0x294   :  { %325 = vsyncadd [#allocation4], 4294967040 }
 0x295   :  { %204 = vsyncpa [#allocation3], 1 }
 0x296   :  { %205 = vsyncpa [#allocation4], 1 }

</bundles_post_ra>
